<compile_context>
chip_gen: v6e
topology: v6e:2x2x1
jax: 0.10.0
libtpu: 0.0.40
codegen_flags: <defaults>
</compile_context>

<pallas_src>
import jax
import jax.numpy as jnp
from jax.experimental import pallas as pl
from jax.experimental.pallas import tpu as pltpu


def _mse_partial_kernel(y_ref, yp_ref, acc_ref):
    """Accumulate per-(time, feature) partial sums of squared error.

    y_ref, yp_ref: (TB, TT, D) blocks (gt already has the system selected via
    the BlockSpec index_map).  acc_ref: (1, TT, D) f32 partial-sum block for
    the current batch-block, resident in VMEM across the time axis.
    """
    @pl.when(pl.program_id(1) == 0)
    def _():
        acc_ref[...] = jnp.zeros_like(acc_ref)

    diff = y_ref[...].astype(jnp.float32) - yp_ref[...].astype(jnp.float32)
    # Pure VPU work: elementwise square, fold the batch-block axis with adds.
    acc_ref[...] += jnp.sum(diff * diff, axis=0, keepdims=True)


def _divisors(n):
    return [d for d in range(1, n + 1) if n % d == 0]


def _vmem_budget():
    """Generation-aware VMEM limit and per-input block-size budget (bytes)."""
    try:
        cap = int(pltpu.get_tpu_info().vmem_capacity_bytes)
    except Exception:
        cap = 64 * 1024 * 1024  # conservative default (v7x per-core VMEM)
    vmem_limit = min((cap * 3) // 4, 96 * 1024 * 1024)
    block_budget = min(vmem_limit // 8, 4 * 1024 * 1024)
    return vmem_limit, block_budget


def _pick_tiles(b, t, d, itemsize, block_budget):
    # Time tile: a multiple of 8 that divides T (sublane-legal), or T itself.
    tt_cands = [x for x in _divisors(t) if x % 8 == 0]
    if t not in tt_cands:
        tt_cands.append(t)
    fitting = [x for x in tt_cands if x * d * itemsize <= block_budget]
    tt = max(fitting) if fitting else min(tt_cands)
    # Batch tile: largest divisor of B keeping the block within budget.
    tb_fitting = [x for x in _divisors(b) if x * tt * d * itemsize <= block_budget]
    tb = max(tb_fitting) if tb_fitting else 1
    return tb, tt


def single_system_mse_pallas(gt_preds: jax.Array,
                             model_preds: jax.Array,
                             system_ind: int) -> jax.Array:
    """mean((gt_preds[:, system_ind] - model_preds)**2) via a Pallas kernel."""
    b, s, t, d = gt_preds.shape
    assert model_preds.shape == (b, t, d), (gt_preds.shape, model_preds.shape)
    assert 0 <= system_ind < s

    itemsize = gt_preds.dtype.itemsize
    vmem_limit, block_budget = _vmem_budget()
    tb, tt = _pick_tiles(b, t, d, itemsize, block_budget)

    block_bytes = tb * tt * d * itemsize
    # Make sure the limit comfortably covers 2 double-buffered inputs + output.
    vmem_limit = max(vmem_limit, 5 * block_bytes + tt * d * 4 + (1 << 20))

    nb, nt = b // tb, t // tt

    partials = pl.pallas_call(
        _mse_partial_kernel,
        out_shape=jax.ShapeDtypeStruct((nb, tt, d), jnp.float32),
        grid_spec=pltpu.PrefetchScalarGridSpec(
            num_scalar_prefetch=0,
            grid=(nb, nt),
            in_specs=[
                # gt: read the selected system directly from the 4D tensor
                # (S dim squeezed, indexed by the static system_ind) -> no copy.
                pl.BlockSpec((tb, None, tt, d),
                             lambda i, j: (i, system_ind, j, 0)),
                pl.BlockSpec((tb, tt, d), lambda i, j: (i, j, 0)),
            ],
            out_specs=pl.BlockSpec((1, tt, d), lambda i, j: (i, 0, 0)),
        ),
        compiler_params=pltpu.CompilerParams(
            dimension_semantics=("parallel", "arbitrary"),
            vmem_limit_bytes=int(vmem_limit),
        ),
    )(gt_preds, model_preds)

    # Final reduce + mean normalization are cheap; keep them in XLA.
    return jnp.sum(partials) / jnp.float32(b * t * d)


class SingleSystemModuleLossPallas:
    """JAX/Pallas equivalent of SingleSystemModuleLoss(system_ind, nn.MSELoss())."""

    def __init__(self, system_ind: int):
        self._system_ind = int(system_ind)

    def __call__(self, inputs: dict) -> jax.Array:
        y_pred = inputs["model_preds"]     # (B, T, D)
        gt = inputs["gt_preds"]            # (B, S, T, D)
        return single_system_mse_pallas(gt, y_pred, self._system_ind)


if __name__ == "__main__":
    key = jax.random.PRNGKey(0)
    k1, k2, k3, k4 = jax.random.split(key, 4)

    # Primary example (matches the module's expected layout).
    B, S, T, D = 2, 3, 8, 32   # batch, num systems, sequence, hidden
    system_ind = 1
    gt_preds = jax.random.normal(k1, (B, S, T, D), dtype=jnp.float32)
    model_preds = jax.random.normal(k2, (B, T, D), dtype=jnp.float32)

    loss_fn = SingleSystemModuleLossPallas(system_ind=system_ind)
    loss = jax.block_until_ready(
        loss_fn({"model_preds": model_preds, "gt_preds": gt_preds}))
    ref = jnp.mean((gt_preds[:, system_ind] - model_preds) ** 2)
    assert jnp.allclose(loss, ref, rtol=1e-5, atol=1e-6), (loss, ref)

    # Secondary check: T not a multiple of 8 and a different system index
    # (exercises the full-T fallback tile and the BlockSpec gather path).
    B2, S2, T2, D2 = 2, 2, 12, 32
    gt2 = jax.random.normal(k3, (B2, S2, T2, D2), dtype=jnp.float32)
    mp2 = jax.random.normal(k4, (B2, T2, D2), dtype=jnp.float32)
    loss2 = jax.block_until_ready(
        SingleSystemModuleLossPallas(0)({"model_preds": mp2, "gt_preds": gt2}))
    ref2 = jnp.mean((gt2[:, 0] - mp2) ** 2)
    assert jnp.allclose(loss2, ref2, rtol=1e-5, atol=1e-6), (loss2, ref2)

    print("KERNEL_OK")
</pallas_src>

<mosaic_0001>
module attributes {stable_mosaic.version = 11 : i64} {
  func.func @_mse_partial_kernel(%arg0: i32, %arg1: i32, %arg2: memref<2x1x8x32xf32, #tpu.memory_space<vmem>>, %arg3: memref<2x8x32xf32, #tpu.memory_space<vmem>>, %arg4: memref<1x8x32xf32, #tpu.memory_space<vmem>>) attributes {dimension_semantics = [#tpu.dimension_semantics<parallel>, #tpu.dimension_semantics<arbitrary>], iteration_bounds = array<i64: 1, 1>, scalar_prefetch = 0 : i64, scratch_operands = 0 : i64, tpu.core_type = #tpu.core_type<tc>, window_params = [{transform_indices = @transform_0, window_bounds = array<i64: 2, 1, 8, 32>}, {transform_indices = @transform_1, window_bounds = array<i64: 2, 8, 32>}, {transform_indices = @transform_2, window_bounds = array<i64: 1, 8, 32>}]} {
    %c0_i32 = arith.constant 0 : i32
    %0 = arith.cmpi eq, %arg1, %c0_i32 : i32
    %1 = arith.extui %0 : i1 to i32
    %c0_i32_0 = arith.constant 0 : i32
    %2 = arith.cmpi ne, %1, %c0_i32_0 : i32
    scf.if %2 {
      %cst_13 = arith.constant 0.000000e+00 : f32
      %13 = vector.broadcast %cst_13 : f32 to vector<1x8x32xf32>
      %c0_14 = arith.constant 0 : index
      %c0_15 = arith.constant 0 : index
      %c0_16 = arith.constant 0 : index
      %14 = vector.load %arg4[%c0_14, %c0_15, %c0_16] : memref<1x8x32xf32, #tpu.memory_space<vmem>>, vector<1x8x32xf32>
      tpu.vector_store %arg4[%c0_14, %c0_15, %c0_16], %13 {strides = array<i32>} : memref<1x8x32xf32, #tpu.memory_space<vmem>>, vector<1x8x32xf32>,
    } else {
    }
    %c0 = arith.constant 0 : index
    %c0_1 = arith.constant 0 : index
    %c0_2 = arith.constant 0 : index
    %c0_3 = arith.constant 0 : index
    %3 = vector.load %arg2[%c0, %c0_1, %c0_2, %c0_3] : memref<2x1x8x32xf32, #tpu.memory_space<vmem>>, vector<2x1x8x32xf32>
    %4 = vector.shape_cast %3 : vector<2x1x8x32xf32> to vector<2x8x32xf32>
    %c0_4 = arith.constant 0 : index
    %c0_5 = arith.constant 0 : index
    %c0_6 = arith.constant 0 : index
    %5 = vector.load %arg3[%c0_4, %c0_5, %c0_6] : memref<2x8x32xf32, #tpu.memory_space<vmem>>, vector<2x8x32xf32>
    %6 = arith.subf %4, %5 : vector<2x8x32xf32>
    %c0_7 = arith.constant 0 : index
    %c0_8 = arith.constant 0 : index
    %c0_9 = arith.constant 0 : index
    %7 = vector.load %arg4[%c0_7, %c0_8, %c0_9] : memref<1x8x32xf32, #tpu.memory_space<vmem>>, vector<1x8x32xf32>
    %8 = arith.mulf %6, %6 : vector<2x8x32xf32>
    %cst = arith.constant dense<0.000000e+00> : vector<8x32xf32>
    %9 = vector.multi_reduction <add>, %8, %cst [0] : vector<2x8x32xf32> to vector<8x32xf32>
    %10 = vector.shape_cast %9 : vector<8x32xf32> to vector<1x8x32xf32>
    %11 = arith.addf %7, %10 : vector<1x8x32xf32>
    %c0_10 = arith.constant 0 : index
    %c0_11 = arith.constant 0 : index
    %c0_12 = arith.constant 0 : index
    %12 = vector.load %arg4[%c0_10, %c0_11, %c0_12] : memref<1x8x32xf32, #tpu.memory_space<vmem>>, vector<1x8x32xf32>
    tpu.vector_store %arg4[%c0_10, %c0_11, %c0_12], %11 {strides = array<i32>} : memref<1x8x32xf32, #tpu.memory_space<vmem>>, vector<1x8x32xf32>,
    return
  }
  func.func @transform_0(%arg0: i32, %arg1: i32) -> (i32, i32, i32, i32) {
    %c1_i32 = arith.constant 1 : i32
    %c0_i32 = arith.constant 0 : i32
    %c0_i32_0 = arith.constant 0 : i32
    return %arg0, %c1_i32, %arg1, %c0_i32 : i32, i32, i32, i32
  }
  func.func @transform_1(%arg0: i32, %arg1: i32) -> (i32, i32, i32) {
    %c0_i32 = arith.constant 0 : i32
    %c0_i32_0 = arith.constant 0 : i32
    return %arg0, %arg1, %c0_i32 : i32, i32, i32
  }
  func.func @transform_2(%arg0: i32, %arg1: i32) -> (i32, i32, i32) {
    %c0_i32 = arith.constant 0 : i32
    %c0_i32_0 = arith.constant 0 : i32
    %c0_i32_1 = arith.constant 0 : i32
    return %arg0, %c0_i32, %c0_i32_0 : i32, i32, i32
  }
}

</mosaic_0001>

<bundles_post_ra>
// kernel: tpu_custom_call.1
= control target key start
LH: loop header
LB: loop body
LE: loop exit
PB: predicated region body
PF: predicated region fallthrough
CT: control target
= control target key end

     0   :  { %7 = vsyncpa [#allocation3], 0  ;;  %s189_s0 = inlined_call_operand.hbm [shape: f32[2,3,8,32], index: 0, kind: input, shape index: {}]   ;;  %s190_s1 = inlined_call_operand.hbm [shape: f32[2,8,32], index: 1, kind: input, shape index: {}]   ;;  %s191_s2 = inlined_call_operand.hbm [shape: f32[1,8,32], index: 2, kind: output, shape index: {}]  }
   0x1   :  { %8 = vsyncpa [#allocation6], 0 }
   0x2   :  { %9 = vsyncpa [#allocation4], 0  ;;  %s15_s11 = scalar_lea.hbm %s189_s0, 128  ;;  %s154_s12 = smov [#allocation2]  }
   0x3   :  { %s16_s13 = sshll.u32 %s154_s12, 4  ;;  %s17_s13 = int_to_ptr.vmem [resolvable:$true] %s16_s13 }
   0x4   :  { %s95_s14 = scalar_lea.vmem %s17_s13, 256  ;;  %p100_p1 = scmp.lt.s32.totalorder %s17_s13, %s17_s13 }
   0x5   :  { %p96_p0 = scmp.ne.s32.totalorder %s17_s13, %s95_s14  ;;  %p101_p2 = scmp.lt.s32.totalorder %s95_s14, %s95_s14 }
   0x7   :  { %p102_p3 = por %p101_p2, %p100_p1 }
   0x9   :  { %p103_p4 = pnand %p102_p3, %p96_p0 }
   0xb   :  { %106 = shalt.err (!%p103_p4)
}
   0xc   :  { %s155_s15 = smov 384   ;;  %s156_s16 = smov 128  }
   0xd   :  { %s157_s17 = smov 8   ;;  %s158_s18 = smov [#allocation5]  }
   0xe   :  { %22 = dma.hbm_to_vmem [thread:$0]  %s15_s11, 256, %s17_s13, [#allocation3], %s155_s15, %s156_s16, %s157_s17  }
   0xf   :  { %s28_s19 = sshll.u32 %s158_s18, 4  ;;  %s29_s19 = int_to_ptr.vmem [resolvable:$true] %s28_s19 }
  0x10   :  { %s116_s20 = scalar_lea.vmem %s29_s19, 256  ;;  %p121_p6 = scmp.lt.s32.totalorder %s29_s19, %s29_s19 }
  0x11   :  { %p117_p5 = scmp.ne.s32.totalorder %s29_s19, %s116_s20  ;;  %p122_p7 = scmp.lt.s32.totalorder %s116_s20, %s116_s20 }
  0x13   :  { %p123_p8 = por %p122_p7, %p121_p6 }
  0x15   :  { %p124_p9 = pnand %p123_p8, %p117_p5 }
  0x17   :  { %127 = shalt.err (!%p124_p9)
}
  0x18   :  { %34 = dma.hbm_to_vmem [thread:$0]  %s190_s1, 256, %s29_s19, [#allocation6], %s156_s16, %s156_s16, %s157_s17  }
  0x19   :  { %148 = dma.done.wait [#allocation3], 256  }
  0x1a   :  { %149 = vsyncadd [#allocation3], 4294967040 }
  0x1b   :  { %150 = dma.done.wait [#allocation6], 256  }
  0x1c   :  { %151 = vsyncadd [#allocation6], 4294967040  ;;  %vm45_vm0 = vcmask 261120   ;;  %v159_v0 = vmov 0.0   ;;  %v47_v1 = vld [vmem:[#allocation2] sm:$0xff]  ;;  %v48_v2 = vld [vmem:[#allocation2 + $0x8] sm:$0xff] }
  0x1d   :  { %46 = vst.msk [vmem:[#allocation7] sm:$0xff] %vm45_vm0, %v159_v0  ;;  %v49_v3 = vld [vmem:[#allocation5] sm:$0xff]  ;;  %v50_v4 = vld [vmem:[#allocation5 + $0x8] sm:$0xff]  ;;  %s160_s1 = smov [#allocation7]  }
  0x1e   :  { %v51_v5 = vsub.f32 %v47_v1, %v49_v3  ;;  %v52_v6 = vsub.f32 %v48_v2, %v50_v4  ;;  %s68_s22 = sshll.u32 %s160_s1, 4  ;;  %s69_s22 = int_to_ptr.vmem [resolvable:$true] %s68_s22 }
  0x1f   :  { %s128_s23 = scalar_lea.vmem %s69_s22, 128  ;;  %p133_p11 = scmp.lt.s32.totalorder %s69_s22, %s69_s22 }
  0x20   :  { %v54_v7 = vmul.f32 %v51_v5, %v51_v5  ;;  %v55_v8 = vmul.f32 %v52_v6, %v52_v6  ;;  %p129_p10 = scmp.ne.s32.totalorder %s69_s22, %s128_s23  ;;  %p134_p12 = scmp.lt.s32.totalorder %s128_s23, %s128_s23 }
  0x22   :  { %v57_v9 = vsel %vm45_vm0, %v54_v7, 0.0  ;;  %v58_v10 = vsel %vm45_vm0, %v55_v8, 0.0  ;;  %p135_p13 = por %p134_p12, %p133_p11 }
  0x23   :  { %v59_v12 = vadd.f32 %v58_v10, %v57_v9 }
  0x24   :  { %v53_v11 = vld [vmem:[#allocation7] sm:$0xff]  ;;  %p136_p0 = pnand %p135_p13, %p129_p10 }
  0x25   :  { %v60_v13 = vadd.f32 %v59_v12, %v53_v11 }
  0x27   :  { %61 = vst.msk [vmem:[#allocation7] sm:$0xff] %vm45_vm0, %v60_v13 }
  0x28   :  { %139 = shalt.err (!%p136_p0)
}
  0x29   :  { %71 = dma.vmem_to_hbm [thread:$0]  %s69_s22, 128, %s191_s2, [#allocation4]  }
  0x2a   :  { %152 = dma.done.wait [#allocation4], 128  }
  0x2b   :  { %153 = vsyncadd [#allocation4], 4294967168 }
  0x2c   :  { %75 = vsyncpa [#allocation3], 1 }
  0x2d   :  { %76 = vsyncpa [#allocation6], 1 }
  0x2e   :  { %77 = vsyncpa [#allocation4], 1 }

</bundles_post_ra>
